<compile_context>
chip_gen: v5e
topology: v5e:2x2
jax: 0.10.0
libtpu: 0.0.40
codegen_flags: <defaults>
</compile_context>

<pallas_src>
import jax
import jax.numpy as jnp
from jax.experimental import pallas as pl
from jax.experimental.pallas import tpu as pltpu


def _partials_kernel(im_ref, l_ref, out_ref):
    # im_ref : (NB, C, H, W) native dtype, VMEM
    # l_ref  : (NB, H, W)    native dtype, VMEM (channel dim squeezed)
    # out_ref: (8, 128) f32  per-chunk partial sums (lanes 0,1,2 used)
    im = im_ref[...].astype(jnp.float32)
    L = l_ref[...].astype(jnp.float32)

    # --- cal_l_init partial: channel max + squared error vs L -------------
    im_max = jnp.max(im, axis=1)                  # (NB, H, W)
    d = im_max - L
    sse = jnp.sum(d * d)

    # --- cal_l_tv partials (no padding -> plain adjacent diffs) -----------
    dh = L[:, 1:, :] - L[:, :-1, :]               # vertical diffs
    h_tv = jnp.sum(dh * dh)
    dw = L[:, :, 1:] - L[:, :, :-1]               # horizontal diffs
    w_tv = jnp.sum(dw * dw)

    # Lane-dense partial-sum tile: lane 0 = h_tv, 1 = w_tv, 2 = sq-error.
    lane = jax.lax.broadcasted_iota(jnp.int32, (8, 128), 1)
    out_ref[...] = (jnp.where(lane == 0, h_tv, 0.0)
                    + jnp.where(lane == 1, w_tv, 0.0)
                    + jnp.where(lane == 2, sse, 0.0))


def lilluination_loss(im, L, tv_loss_weight=1.0):
    """JAX/Pallas equivalent of LIlluination(tv_loss_weight).forward(im, L)."""
    N, C, H, W = im.shape
    assert L.shape == (N, 1, H, W), "L must be a (N, 1, H, W) illumination map"
    assert H >= 2 and W >= 2

    # Pick a batch-chunk size NB (dividing N) so each grid step moves ~2 MiB.
    itemsize = max(jnp.dtype(im.dtype).itemsize, jnp.dtype(L.dtype).itemsize)
    per_im_bytes = (C + 1) * H * W * itemsize
    target_bytes = 2 * 1024 * 1024
    nb = max(1, min(N, target_bytes // max(per_im_bytes, 1)))
    while N % nb:
        nb -= 1
    g = N // nb

    flops = int(N * H * W * (C + 10))
    bytes_accessed = int(im.size * jnp.dtype(im.dtype).itemsize
                         + L.size * jnp.dtype(L.dtype).itemsize
                         + g * 8 * 128 * 4)

    parts = pl.pallas_call(
        _partials_kernel,
        out_shape=jax.ShapeDtypeStruct((g, 8, 128), jnp.float32),
        grid_spec=pltpu.PrefetchScalarGridSpec(
            num_scalar_prefetch=0,
            grid=(g,),
            in_specs=[
                # one batch chunk per step; full C/H/W extents (no padding)
                pl.BlockSpec((nb, C, H, W), lambda b: (b, 0, 0, 0)),
                # illumination map: channel dim squeezed out
                pl.BlockSpec((nb, None, H, W), lambda b: (b, 0, 0, 0)),
            ],
            out_specs=pl.BlockSpec((None, 8, 128), lambda b: (b, 0, 0)),
        ),
        compiler_params=pltpu.CompilerParams(
            dimension_semantics=("parallel",)),
        cost_estimate=pl.CostEstimate(
            flops=flops, transcendentals=0, bytes_accessed=bytes_accessed),
    )(im, L)

    # Final combine over per-chunk partials (3-element work; free in XLA).
    h_tv = jnp.sum(parts[:, 0, 0])
    w_tv = jnp.sum(parts[:, 0, 1])
    sse = jnp.sum(parts[:, 0, 2])

    inv_count_h = 1.0 / float((H - 1) * W)
    inv_count_w = 1.0 / float(H * (W - 1))
    l_tv = (float(tv_loss_weight) * 2.0 / float(N)) * (
        h_tv * inv_count_h + w_tv * inv_count_w)
    l_init = sse * (1.0 / float(N * H * W))
    return l_tv + l_init


def _ref_lilluination(im, L, tv_loss_weight=1.0):
    """Pure-JAX reference mirroring the PyTorch module."""
    im = im.astype(jnp.float32)
    L = L.astype(jnp.float32)
    N, _, H, W = im.shape
    im_max = jnp.max(im, axis=1, keepdims=True)
    l_init = jnp.mean((im_max - L) ** 2)
    count_h = (H - 1) * W
    count_w = H * (W - 1)
    h_tv = jnp.sum((L[:, :, 1:, :] - L[:, :, :-1, :]) ** 2)
    w_tv = jnp.sum((L[:, :, :, 1:] - L[:, :, :, :-1]) ** 2)
    l_tv = tv_loss_weight * 2.0 * (h_tv / count_h + w_tv / count_w) / N
    return l_tv + l_init


if __name__ == "__main__":
    key = jax.random.PRNGKey(0)
    k1, k2 = jax.random.split(key)
    im = jax.random.uniform(k1, (2, 3, 16, 16), dtype=jnp.float32)
    L = jax.random.uniform(k2, (2, 1, 16, 16), dtype=jnp.float32)

    loss = jax.block_until_ready(lilluination_loss(im, L))
    ref = jax.block_until_ready(_ref_lilluination(im, L))

    assert jnp.isfinite(loss), "kernel produced non-finite loss"
    assert abs(float(loss) - float(ref)) < 1e-4, (float(loss), float(ref))
    print("KERNEL_OK")
</pallas_src>

<mosaic_0001>
module attributes {stable_mosaic.version = 11 : i64} {
  func.func @_partials_kernel(%arg0: i32, %arg1: memref<2x3x16x16xf32, #tpu.memory_space<vmem>>, %arg2: memref<2x1x16x16xf32, #tpu.memory_space<vmem>>, %arg3: memref<1x8x128xf32, #tpu.memory_space<vmem>>) attributes {dimension_semantics = [#tpu.dimension_semantics<parallel>], iteration_bounds = array<i64: 1>, scalar_prefetch = 0 : i64, scratch_operands = 0 : i64, tpu.core_type = #tpu.core_type<tc>, window_params = [{transform_indices = @transform_0, window_bounds = array<i64: 2, 3, 16, 16>}, {transform_indices = @transform_1, window_bounds = array<i64: 2, 1, 16, 16>}, {transform_indices = @transform_2, window_bounds = array<i64: 1, 8, 128>}]} {
    %c0 = arith.constant 0 : index
    %c0_0 = arith.constant 0 : index
    %c0_1 = arith.constant 0 : index
    %c0_2 = arith.constant 0 : index
    %0 = vector.load %arg1[%c0, %c0_0, %c0_1, %c0_2] : memref<2x3x16x16xf32, #tpu.memory_space<vmem>>, vector<2x3x16x16xf32>
    %c0_3 = arith.constant 0 : index
    %c0_4 = arith.constant 0 : index
    %c0_5 = arith.constant 0 : index
    %c0_6 = arith.constant 0 : index
    %1 = vector.load %arg2[%c0_3, %c0_4, %c0_5, %c0_6] : memref<2x1x16x16xf32, #tpu.memory_space<vmem>>, vector<2x1x16x16xf32>
    %2 = vector.shape_cast %1 : vector<2x1x16x16xf32> to vector<2x16x16xf32>
    %cst = arith.constant dense<0xFF800000> : vector<2x16x16xf32>
    %3 = vector.multi_reduction <maximumf>, %0, %cst [1] : vector<2x3x16x16xf32> to vector<2x16x16xf32>
    %4 = arith.subf %3, %2 : vector<2x16x16xf32>
    %5 = arith.mulf %4, %4 : vector<2x16x16xf32>
    %6 = vector.shape_cast %5 : vector<2x16x16xf32> to vector<1x2x16x16xf32>
    %cst_7 = arith.constant dense<0.000000e+00> : vector<1xf32>
    %7 = vector.multi_reduction <add>, %6, %cst_7 [1, 2, 3] : vector<1x2x16x16xf32> to vector<1xf32>
    %8 = vector.shape_cast %7 : vector<1xf32> to vector<1x1x1x1xf32>
    %9 = vector.extract %8[0, 0, 0, 0] : f32 from vector<1x1x1x1xf32>
    %10 = vector.extract_strided_slice %2 {offsets = [0, 1, 0], sizes = [2, 15, 16], strides = [1, 1, 1]} : vector<2x16x16xf32> to vector<2x15x16xf32>
    %11 = vector.extract_strided_slice %2 {offsets = [0, 0, 0], sizes = [2, 15, 16], strides = [1, 1, 1]} : vector<2x16x16xf32> to vector<2x15x16xf32>
    %12 = arith.subf %10, %11 : vector<2x15x16xf32>
    %13 = arith.mulf %12, %12 : vector<2x15x16xf32>
    %14 = vector.shape_cast %13 : vector<2x15x16xf32> to vector<1x2x15x16xf32>
    %cst_8 = arith.constant dense<0.000000e+00> : vector<1xf32>
    %15 = vector.multi_reduction <add>, %14, %cst_8 [1, 2, 3] : vector<1x2x15x16xf32> to vector<1xf32>
    %16 = vector.shape_cast %15 : vector<1xf32> to vector<1x1x1x1xf32>
    %17 = vector.extract %16[0, 0, 0, 0] : f32 from vector<1x1x1x1xf32>
    %18 = vector.extract_strided_slice %2 {offsets = [0, 0, 1], sizes = [2, 16, 15], strides = [1, 1, 1]} : vector<2x16x16xf32> to vector<2x16x15xf32>
    %19 = vector.extract_strided_slice %2 {offsets = [0, 0, 0], sizes = [2, 16, 15], strides = [1, 1, 1]} : vector<2x16x16xf32> to vector<2x16x15xf32>
    %20 = arith.subf %18, %19 : vector<2x16x15xf32>
    %21 = arith.mulf %20, %20 : vector<2x16x15xf32>
    %22 = vector.shape_cast %21 : vector<2x16x15xf32> to vector<1x2x16x15xf32>
    %cst_9 = arith.constant dense<0.000000e+00> : vector<1xf32>
    %23 = vector.multi_reduction <add>, %22, %cst_9 [1, 2, 3] : vector<1x2x16x15xf32> to vector<1xf32>
    %24 = vector.shape_cast %23 : vector<1xf32> to vector<1x1x1x1xf32>
    %25 = vector.extract %24[0, 0, 0, 0] : f32 from vector<1x1x1x1xf32>
    %26 = tpu.iota {dimensions = array<i32: 1>} : vector<8x128xi32>
    %c0_i32 = arith.constant 0 : i32
    %27 = vector.broadcast %c0_i32 : i32 to vector<8x128xi32>
    %28 = arith.cmpi eq, %26, %27 : vector<8x128xi32>
    %cst_10 = arith.constant 0.000000e+00 : f32
    %29 = vector.broadcast %17 : f32 to vector<8x128xf32>
    %30 = vector.broadcast %cst_10 : f32 to vector<8x128xf32>
    %31 = arith.select %28, %29, %30 : vector<8x128xi1>, vector<8x128xf32>
    %c1_i32 = arith.constant 1 : i32
    %32 = vector.broadcast %c1_i32 : i32 to vector<8x128xi32>
    %33 = arith.cmpi eq, %26, %32 : vector<8x128xi32>
    %cst_11 = arith.constant 0.000000e+00 : f32
    %34 = vector.broadcast %25 : f32 to vector<8x128xf32>
    %35 = vector.broadcast %cst_11 : f32 to vector<8x128xf32>
    %36 = arith.select %33, %34, %35 : vector<8x128xi1>, vector<8x128xf32>
    %37 = arith.addf %31, %36 : vector<8x128xf32>
    %c2_i32 = arith.constant 2 : i32
    %38 = vector.broadcast %c2_i32 : i32 to vector<8x128xi32>
    %39 = arith.cmpi eq, %26, %38 : vector<8x128xi32>
    %cst_12 = arith.constant 0.000000e+00 : f32
    %40 = vector.broadcast %9 : f32 to vector<8x128xf32>
    %41 = vector.broadcast %cst_12 : f32 to vector<8x128xf32>
    %42 = arith.select %39, %40, %41 : vector<8x128xi1>, vector<8x128xf32>
    %43 = arith.addf %37, %42 : vector<8x128xf32>
    %c0_13 = arith.constant 0 : index
    %c0_14 = arith.constant 0 : index
    %c0_15 = arith.constant 0 : index
    %44 = vector.load %arg3[%c0_13, %c0_14, %c0_15] : memref<1x8x128xf32, #tpu.memory_space<vmem>>, vector<1x8x128xf32>
    %45 = vector.shape_cast %44 : vector<1x8x128xf32> to vector<8x128xf32>
    %46 = vector.shape_cast %43 : vector<8x128xf32> to vector<1x8x128xf32>
    tpu.vector_store %arg3[%c0_13, %c0_14, %c0_15], %46 {strides = array<i32>} : memref<1x8x128xf32, #tpu.memory_space<vmem>>, vector<1x8x128xf32>,
    return
  }
  func.func @transform_0(%arg0: i32) -> (i32, i32, i32, i32) {
    %c0_i32 = arith.constant 0 : i32
    %c0_i32_0 = arith.constant 0 : i32
    %c0_i32_1 = arith.constant 0 : i32
    %c0_i32_2 = arith.constant 0 : i32
    return %arg0, %c0_i32, %c0_i32_0, %c0_i32_1 : i32, i32, i32, i32
  }
  func.func @transform_1(%arg0: i32) -> (i32, i32, i32, i32) {
    %c0_i32 = arith.constant 0 : i32
    %c0_i32_0 = arith.constant 0 : i32
    %c0_i32_1 = arith.constant 0 : i32
    %c0_i32_2 = arith.constant 0 : i32
    return %arg0, %c0_i32, %c0_i32_0, %c0_i32_1 : i32, i32, i32, i32
  }
  func.func @transform_2(%arg0: i32) -> (i32, i32, i32) {
    %c0_i32 = arith.constant 0 : i32
    %c0_i32_0 = arith.constant 0 : i32
    %c0_i32_1 = arith.constant 0 : i32
    return %arg0, %c0_i32, %c0_i32_0 : i32, i32, i32
  }
}

</mosaic_0001>

<bundles_post_ra>
// kernel: tpu_custom_call.1
= control target key start
LH: loop header
LB: loop body
LE: loop exit
PB: predicated region body
PF: predicated region fallthrough
CT: control target
= control target key end

     0   :  { %7 = vsyncpa [#allocation3], 0  ;;  %s415_s0 = inlined_call_operand.hbm [shape: f32[2,3,16,16], index: 0, kind: input, shape index: {}]   ;;  %s416_s1 = inlined_call_operand.hbm [shape: f32[2,1,16,16], index: 1, kind: input, shape index: {}]   ;;  %s417_s2 = inlined_call_operand.hbm [shape: f32[1,8,128], index: 2, kind: output, shape index: {}]  }
   0x1   :  { %8 = vsyncpa [#allocation6], 0 }
   0x2   :  { %9 = vsyncpa [#allocation4], 0  ;;  %s14_s11 = sshll.u32 %s415_s0, 4  ;;  %s336_s12 = smov [#allocation2]   ;;  %s15_s11 = int_to_ptr.hbm [resolvable:$true] %s14_s11 }
   0x3   :  { %s16_s13 = sshll.u32 %s336_s12, 4  ;;  %s27_s16 = sshll.u32 %s416_s1, 4  ;;  %s17_s13 = int_to_ptr.vmem [resolvable:$true] %s16_s13  ;;  %s28_s16 = int_to_ptr.hbm [resolvable:$true] %s27_s16 }
   0x4   :  { %s337_s17 = smov 128   ;;  %s338_s18 = smov 8  }
   0x5   :  { %22 = dma.hbm_to_vmem [thread:$0]  %s15_s11, 1536, %s17_s13, [#allocation3], %s337_s17, %s337_s17, %s338_s18  }
   0x6   :  { %s339_s19 = smov [#allocation5]  }
   0x7   :  { %s29_s20 = sshll.u32 %s339_s19, 4  ;;  %s30_s20 = int_to_ptr.vmem [resolvable:$true] %s29_s20 }
   0x8   :  { %35 = dma.hbm_to_vmem [thread:$0]  %s28_s16, 512, %s30_s20, [#allocation6], %s337_s17, %s337_s17, %s338_s18  }
   0x9   :  { %330 = dma.done.wait [#allocation3], 1536  }
   0xa   :  { %331 = vsyncadd [#allocation3], 4294965760 }
   0xb   :  { %332 = dma.done.wait [#allocation6], 512  }
   0xc   :  { %333 = vsyncadd [#allocation6], 4294966784  ;;  %v364_v0 = vld [vmem:[#allocation5 + $0x10] sm:$0xff]  ;;  %v366_v1 = vld [vmem:[#allocation5] sm:$0xff]  ;;  %s340_s0 = smov 1   ;;  %s341_s1 = smov 127  }
   0xd   :  { %164 = vrot.lane.b32.xlu1 %v364_v0, %s340_s0  ;;  %160 = vrot.lane.b32.xlu0 %v366_v1, %s340_s0  ;;  %v370_v2 = vld [vmem:[#allocation5 + $0x18] sm:$0xff]  ;;  %v372_v3 = vld [vmem:[#allocation5 + $0x8] sm:$0xff]  ;;  %v110_v16 = vrot.slane %v366_v1, 7  ;;  %vm60_vm0 = vcmask 130048   ;;  %v44_v19 = vld [vmem:[#allocation2] sm:$0xff]  ;;  %vm109_vm1 = vcmask 1040384  }
   0xe   :  { %v111_v17 = vrot.slane %v372_v3, 7  ;;  %v45_v20 = vld [vmem:[#allocation2 + $0x8] sm:$0xff]  ;;  %v46_v21 = vld [vmem:[#allocation2 + $0x10] sm:$0xff]  ;;  %v47_v22 = vld [vmem:[#allocation2 + $0x18] sm:$0xff]  ;;  %v61_v23 = vsel %vm60_vm0, %v44_v19, -inf  ;;  %v113_v27 = vrot.slane %v364_v0, 7 }
   0xf   :  { %v120_v18 = vsub.f32 %v366_v1, %v110_v16  ;;  %v62_v24 = vsel %vm60_vm0, %v46_v21, -inf  ;;  %v66_v25 = vsel %vm60_vm0, %v45_v20, -inf  ;;  %v114_v28 = vrot.slane %v370_v2, 7  ;;  %v48_v29 = vld [vmem:[#allocation2 + $0x20] sm:$0xff]  ;;  %v49_v30 = vld [vmem:[#allocation2 + $0x28] sm:$0xff]  ;;  %v50_v31 = vld [vmem:[#allocation2 + $0x30] sm:$0xff] }
  0x10   :  { %v112_v26 = vsel %vm109_vm1, %v110_v16, %v111_v17  ;;  %v63_v32 = vmax.f32 %v61_v23, %v62_v24  ;;  %v52_v34 = vld [vmem:[#allocation2 + $0x40] sm:$0xff]  ;;  %v64_v35 = vsel %vm60_vm0, %v48_v29, -inf  ;;  %v67_v36 = vsel %vm60_vm0, %v47_v22, -inf  ;;  %v51_v39 = vld [vmem:[#allocation2 + $0x38] sm:$0xff]  ;;  %v54_v40 = vld [vmem:[#allocation2 + $0x50] sm:$0xff]  ;;  %s342_s24 = smov [#allocation7]  }
  0x11   :  { %v121_v33 = vsub.f32 %v372_v3, %v112_v26  ;;  %v69_v37 = vsel %vm60_vm0, %v49_v30, -inf  ;;  %v115_v38 = vsel %vm109_vm1, %v113_v27, %v114_v28  ;;  %v68_v42 = vmax.f32 %v66_v25, %v67_v36  ;;  %v53_v48 = vld [vmem:[#allocation2 + $0x48] sm:$0xff]  ;;  %v55_v49 = vld [vmem:[#allocation2 + $0x58] sm:$0xff]  ;;  %s232_s25 = sshll.u32 %s342_s24, 4  ;;  %s234_s28 = sshll.u32 %s417_s2, 4  ;;  %s233_s25 = int_to_ptr.vmem [resolvable:$true] %s232_s25  ;;  %s235_s28 = int_to_ptr.hbm [resolvable:$true] %s234_s28 }
  0x12   :  { %v65_v41 = vmax.f32 %v63_v32, %v64_v35  ;;  %v71_v43 = vsel %vm60_vm0, %v50_v31, -inf  ;;  %v122_v44 = vsub.f32 %v364_v0, %v113_v27  ;;  %v123_v45 = vsub.f32 %v370_v2, %v115_v38 }
  0x13   :  { %v124_v46 = vmul.f32 %v120_v18, %v120_v18  ;;  %v125_v47 = vmul.f32 %v121_v33, %v121_v33  ;;  %v70_v50 = vmax.f32 %v68_v42, %v69_v37  ;;  %v72_v51 = vsel %vm60_vm0, %v52_v34, -inf }
  0x14   :  { %v74_v52 = vsel %vm60_vm0, %v54_v40, -inf  ;;  %v76_v53 = vsel %vm60_vm0, %v51_v39, -inf  ;;  %v126_v54 = vmul.f32 %v122_v44, %v122_v44  ;;  %v127_v55 = vmul.f32 %v123_v45, %v123_v45 }
  0x15   :  { %166 = vrot.lane.b32.xlu1 %v370_v2, %s340_s0  ;;  %162 = vrot.lane.b32.xlu0 %v372_v3, %s340_s0  ;;  %v133_v56 = vrot.slane %v124_v46, 1  ;;  %v134_v57 = vrot.slane %v125_v47, 1  ;;  %vm132_vm2 = vcmask 1046528   ;;  %v73_v58 = vmax.f32 %v71_v43, %v72_v51 }
  0x16   :  { %v77_v59 = vsel %vm60_vm0, %v53_v48, -inf  ;;  %v79_v60 = vsel %vm60_vm0, %v55_v49, -inf  ;;  %v136_v62 = vrot.slane %v126_v54, 1  ;;  %v137_v63 = vrot.slane %v127_v55, 1 }
  0x17   :  { %v135_v61 = vsel %vm132_vm2, %v133_v56, %v134_v57  ;;  %vm144_vm3 = vcmask 129024   ;;  %vm196_vm4 = vcmask 121856  }
  0x18   :  { %v149_v16 = vsel %vm144_vm3, %v137_v63, 0.0 }
  0x7f   :  { %v165_v4 = vpop.permute.xlu1 %164  ;;  %v161_v5 = vpop.permute.xlu0 %160 }
  0x80   :  { %v174_v6 = vsub.f32 %v364_v0, %v165_v4  ;;  %v172_v7 = vsub.f32 %v366_v1, %v161_v5  ;;  %v143_v4 = vsel %vm60_vm0, %v135_v61, 0.0  ;;  %v145_v5 = vsel %vm144_vm3, %v134_v57, 0.0 }
  0x82   :  { %v178_v8 = vmul.f32 %v174_v6, %v174_v6  ;;  %v176_v9 = vmul.f32 %v172_v7, %v172_v7  ;;  %v75_v6 = vmax.f32 %v73_v58, %v74_v52  ;;  %v78_v7 = vmax.f32 %v76_v53, %v77_v59 }
  0x83   :  { %v213_v58 = vlaneseq }
  0x84   :  { %188 = vrot.lane.b32.xlu0 %v178_v8, %s341_s1  ;;  %184 = vrot.lane.b32.xlu2 %v176_v9, %s341_s1  ;;  %v138_v8 = vsel %vm132_vm2, %v136_v62, %v137_v63  ;;  %v146_v9 = vadd.f32 %v145_v5, %v143_v4 }
  0x85   :  { %v214_v59 = vand.u32 127, %v213_v58 }
  0x87   :  { %v167_v10 = vpop.permute.xlu1 %166  ;;  %v163_v11 = vpop.permute.xlu0 %162  ;;  %vm215_vm5 = vcmp.eq.s32.totalorder %v214_v59, 0  ;;  %vm218_vm6 = vcmp.eq.s32.totalorder %v214_v59, 1  ;;  %vm222_vm7 = vcmp.eq.s32.totalorder %v214_v59, 2 }
  0x88   :  { %v175_v12 = vsub.f32 %v370_v2, %v167_v10  ;;  %v173_v13 = vsub.f32 %v372_v3, %v163_v11  ;;  %v81_v10 = vsub.f32 %v65_v41, %v366_v1  ;;  %v82_v11 = vsub.f32 %v70_v50, %v372_v3 }
  0x8a   :  { %v179_v14 = vmul.f32 %v175_v12, %v175_v12  ;;  %v177_v15 = vmul.f32 %v173_v13, %v173_v13  ;;  %v147_v12 = vsel %vm60_vm0, %v138_v8, 0.0  ;;  %v80_v13 = vmax.f32 %v78_v7, %v79_v60 }
  0x8b   :  { %v85_v17 = vmul.f32 %v81_v10, %v81_v10  ;;  %v86_v18 = vmul.f32 %v82_v11, %v82_v11 }
  0x8c   :  { %190 = vrot.lane.b32.xlu1 %v179_v14, %s341_s1  ;;  %186 = vrot.lane.b32.xlu2 %v177_v15, %s341_s1  ;;  %v83_v14 = vsub.f32 %v75_v6, %v364_v0  ;;  %v148_v15 = vadd.f32 %v147_v12, %v146_v9  ;;  %v84_v19 = vsub.f32 %v80_v13, %v370_v2 }
  0x8d   :  { %v89_v22 = vsel %vm60_vm0, %v85_v17, 0.0  ;;  %v90_v23 = vsel %vm60_vm0, %v86_v18, 0.0 }
  0x8e   :  { %v87_v20 = vmul.f32 %v83_v14, %v83_v14  ;;  %v150_v21 = vadd.f32 %v149_v16, %v148_v15  ;;  %v88_v1 = vmul.f32 %v84_v19, %v84_v19  ;;  %v91_v24 = vadd.f32 %v90_v23, %v89_v22 }
  0x90   :  { %v92_v3 = vsel %vm60_vm0, %v87_v20, 0.0  ;;  %v94_v0 = vsel %vm60_vm0, %v88_v1, 0.0 }
  0x91   :  { %v93_v25 = vadd.f32 %v92_v3, %v91_v24 }
  0x93   :  { %v95_v26 = vadd.f32 %v94_v0, %v93_v25 }
  0xae   :  { %151 = vadd.xlane.f32.xlu0 %v150_v21 }
  0xb5   :  { %96 = vadd.xlane.f32.xlu2 %v95_v26 }
  0xde   :  { %v185_v27 = vpop.permute.xlu2 %184 }
  0xdf   :  { %v197_v29 = vsel %vm196_vm4, %v185_v27, 0.0 }
  0xe6   :  { %v187_v28 = vpop.permute.xlu2 %186 }
  0xe7   :  { %v198_v30 = vsel %vm196_vm4, %v187_v28, 0.0 }
  0xe8   :  { %v199_v32 = vadd.f32 %v198_v30, %v197_v29 }
  0xf6   :  { %v189_v2 = vpop.permute.xlu0 %188 }
  0xf7   :  { %v200_v31 = vsel %vm196_vm4, %v189_v2, 0.0 }
  0xf8   :  { %v201_v33 = vadd.f32 %v200_v31, %v199_v32 }
  0xfe   :  { %v191_v34 = vpop.permute.xlu1 %190 }
  0xff   :  { %v202_v35 = vsel %vm196_vm4, %v191_v34, 0.0 }
 0x100   :  { %v203_v36 = vadd.f32 %v202_v35, %v201_v33 }
 0x102   :  { %204 = vadd.xlane.f32.xlu1 %v203_v36 }
 0x121   :  { %v152_v37 = vpop.xlane.xlu0 %151 }
 0x122   :  { %v153_v38 = vrot.slane %v152_v37, 4 }
 0x124   :  { %v154_v39 = vadd.f32 %v153_v38, %v152_v37 }
 0x126   :  { %v155_v40 = vrot.slane %v154_v39, 2 }
 0x128   :  { %v97_v41 = vpop.xlane.xlu2 %96  ;;  %v156_v43 = vadd.f32 %v155_v40, %v154_v39 }
 0x129   :  { %v98_v42 = vrot.slane %v97_v41, 4 }
 0x12a   :  { %v157_v46 = vrot.slane %v156_v43, 1 }
 0x12b   :  { %v99_v44 = vadd.f32 %v98_v42, %v97_v41 }
 0x12c   :  { %v158_v49 = vadd.f32 %v157_v46, %v156_v43 }
 0x12d   :  { %v100_v45 = vrot.slane %v99_v44, 2 }
 0x12f   :  { %v101_v47 = vadd.f32 %v100_v45, %v99_v44 }
 0x131   :  { %v102_v48 = vrot.slane %v101_v47, 1 }
 0x133   :  { %v103_v50 = vadd.f32 %v102_v48, %v101_v47 }
 0x135   :  { %245 = vpush %v103_v50 }
 0x136   :  { %247 = vpush %v158_v49 }
 0x166   :  { %s246_s21 = spop %245 }
 0x167   :  { %s248_s22 = spop %247  ;;  %v223_v61 = vstv %s246_s21 }
 0x168   :  { %v216_v60 = vstv %s248_s22  ;;  %v224_v6 = vsel %vm222_vm7, %v223_v61, 0.0 }
 0x169   :  { %v217_v63 = vsel %vm215_vm5, %v216_v60, 0.0 }
 0x175   :  { %v205_v51 = vpop.xlane.xlu1 %204 }
 0x176   :  { %v206_v52 = vrot.slane %v205_v51, 4 }
 0x178   :  { %v207_v53 = vadd.f32 %v206_v52, %v205_v51 }
 0x17a   :  { %v208_v54 = vrot.slane %v207_v53, 2 }
 0x17c   :  { %v209_v55 = vadd.f32 %v208_v54, %v207_v53 }
 0x17e   :  { %v210_v56 = vrot.slane %v209_v55, 1 }
 0x180   :  { %v211_v57 = vadd.f32 %v210_v56, %v209_v55 }
 0x182   :  { %249 = vpush %v211_v57 }
 0x1b3   :  { %s250_s23 = spop %249 }
 0x1b4   :  { %v219_v62 = vstv %s250_s23 }
 0x1b5   :  { %v220_v4 = vsel %vm218_vm6, %v219_v62, 0.0 }
 0x1b6   :  { %v221_v5 = vadd.f32 %v220_v4, %v217_v63 }
 0x1b8   :  { %v225_v7 = vadd.f32 %v224_v6, %v221_v5 }
 0x1ba   :  { %226 = vst [vmem:[#allocation7] sm:$0xff] %v225_v7 }
 0x1bb   :  { %237 = dma.vmem_to_hbm [thread:$0]  %s233_s25, 128, %s235_s28, [#allocation4]  }
 0x1bc   :  { %334 = dma.done.wait [#allocation4], 128  }
 0x1bd   :  { %335 = vsyncadd [#allocation4], 4294967168 }
 0x1be   :  { %242 = vsyncpa [#allocation3], 1 }
 0x1bf   :  { %243 = vsyncpa [#allocation6], 1 }
 0x1c0   :  { %244 = vsyncpa [#allocation4], 1 }

</bundles_post_ra>
